<compile_context>
chip_gen: v5e
topology: v5e:2x2
jax: 0.10.0
libtpu: 0.0.40
codegen_flags: <defaults>
</compile_context>

<pallas_src>
import functools

import jax
import jax.numpy as jnp
from jax import lax
from jax.experimental import pallas as pl
from jax.experimental.pallas import tpu as pltpu

LANE = 128        # lane width (last-dim granule)
SUB_BF16 = 16     # bf16 sublane granule (min bf16 tile is (16, 128))
NUM_CLASSES = 2   # self.fc = nn.Linear(output_size, 2)


def _round_up(n, m):
    return (n + m - 1) // m * m


def _pad2(a, rows, cols, dtype):
    return jnp.pad(a, ((0, rows - a.shape[0]), (0, cols - a.shape[1]))).astype(dtype)


# --------------------------- One-time param packing ---------------------------

def pack_params(params):
    """Pad + pack all weights/biases ONCE (outside the per-call hot path)."""
    in1, hidden = params["mlp1"]["fc1"][0].shape
    in2 = params["mlp2"]["fc1"][0].shape[0]
    out_sz = params["mlp1"]["fc3"][0].shape[1]
    os3 = params["mlp3"]["fc1"][0].shape[0]
    nc = params["fc"][0].shape[1]
    assert nc == NUM_CLASSES

    # Common lane-dense padded dim for every feature/contraction axis except
    # mlp3's K (= os3 = N1), which stays at its small sublane padding.
    wdim = _round_up(max(in1, in2, hidden, out_sz, nc), LANE)
    os3_pad = _round_up(os3, SUB_BF16)
    # TODO(synk): on v6e/v7x round `wdim` up to 256 (2x256x256 MXU) once real
    # feature sizes exceed 128; 128 is only the natural granule on v5e.

    def wpad(w):  # (K, N) -> (wdim, wdim) bf16, zero padded
        return _pad2(w, wdim, wdim, jnp.bfloat16)

    # Weight slab: the 9 weights whose padded shape is (wdim, wdim).
    # Order: [w11, w12, w13, w21, w22, w23, w32, w33, wfc]
    wslab = jnp.stack([
        wpad(params["mlp1"]["fc1"][0]), wpad(params["mlp1"]["fc2"][0]),
        wpad(params["mlp1"]["fc3"][0]),
        wpad(params["mlp2"]["fc1"][0]), wpad(params["mlp2"]["fc2"][0]),
        wpad(params["mlp2"]["fc3"][0]),
        wpad(params["mlp3"]["fc2"][0]), wpad(params["mlp3"]["fc3"][0]),
        wpad(params["fc"][0]),
    ])
    # mlp3.fc1: its contraction dim is os3 (== N1); keep the small padding.
    w31 = _pad2(params["mlp3"]["fc1"][0], os3_pad, wdim, jnp.bfloat16)

    # Bias slab (f32: bias-add / relu stay f32 on every TPU generation).
    # Order: [b11, b12, b13, b21, b22, b23, b31, b32, b33, bfc]
    biases = [
        params["mlp1"]["fc1"][1], params["mlp1"]["fc2"][1], params["mlp1"]["fc3"][1],
        params["mlp2"]["fc1"][1], params["mlp2"]["fc2"][1], params["mlp2"]["fc3"][1],
        params["mlp3"]["fc1"][1], params["mlp3"]["fc2"][1], params["mlp3"]["fc3"][1],
        params["fc"][1],
    ]
    bslab = jnp.stack([jnp.pad(b, (0, wdim - b.shape[0])).astype(jnp.float32)
                       for b in biases])
    bslab = jnp.pad(bslab, ((0, _round_up(bslab.shape[0], 8) - bslab.shape[0]), (0, 0)))

    packed = {"wslab": wslab, "w31": w31, "bslab": bslab}
    cfg = {"wdim": wdim, "os3": os3, "os3_pad": os3_pad, "num_classes": nc}
    return packed, cfg


# ------------------------------ Fused kernel ---------------------------------

def _fused_kernel(x1_ref, x2_ref, w_ref, w31_ref, b_ref, o_ref, *, num_classes):
    """Entire SharedSemanticSpace forward; every intermediate stays in VMEM.

    x1_ref : (n1_pad, wdim)  bf16      x2_ref : (n2_pad, wdim) bf16
    w_ref  : (9, wdim, wdim) bf16      w31_ref: (os3_pad, wdim) bf16
    b_ref  : (>=10, wdim)    f32       o_ref  : (n2_pad, wdim)  f32
    """

    def dense(x, wi, bi, relu):
        y = jnp.dot(x, w_ref[wi], preferred_element_type=jnp.float32)
        y = y + b_ref[bi:bi + 1, :]
        if relu:
            y = jnp.maximum(y, 0.0)
        return y.astype(jnp.bfloat16)

    # output1 = mlp1(input1), output2 = mlp2(input2)
    o1 = dense(dense(dense(x1_ref[...], 0, 0, True), 1, 1, True), 2, 2, False)
    o2 = dense(dense(dense(x2_ref[...], 3, 3, True), 4, 4, True), 5, 5, False)

    # combined = output2 @ output1.T : contract the LAST dim of both (no .T /
    # XLU transpose). Padded feature columns of o1/o2 are exactly zero.
    combined = lax.dot_general(
        o2, o1, dimension_numbers=(((1,), (1,)), ((), ())),
        preferred_element_type=jnp.float32).astype(jnp.bfloat16)

    # mlp3: the garbage columns of `combined` (bias-propagated padded rows of
    # o1) hit zero-padded rows of w31, so they contribute nothing.
    h = jnp.dot(combined, w31_ref[...], preferred_element_type=jnp.float32)
    h = jnp.maximum(h + b_ref[6:7, :], 0.0).astype(jnp.bfloat16)
    f = dense(dense(h, 6, 7, True), 7, 8, False)

    # fc + exact softmax over the true `num_classes` columns only.
    logits = jnp.dot(f, w_ref[8], preferred_element_type=jnp.float32) + b_ref[9:10, :]
    col = lax.broadcasted_iota(jnp.int32, logits.shape, 1)
    valid = col < num_classes
    logits = jnp.where(valid, logits, -1e30)
    logits = logits - jnp.max(logits, axis=1, keepdims=True)
    e = jnp.where(valid, jnp.exp(logits), 0.0)
    o_ref[...] = (e / jnp.sum(e, axis=1, keepdims=True)).astype(o_ref.dtype)


# ------------------------------ Forward wrapper -------------------------------

def _forward_impl(packed, input1, input2, *, wdim, os3, os3_pad, num_classes):
    n1, _ = input1.shape
    n2, _ = input2.shape
    # combined_output is (N2, N1) and feeds mlp3 whose input size is os3,
    # so the module is only well-defined when os3 == N1.
    assert n1 == os3, f"input1 rows ({n1}) must equal mlp3 input size ({os3})"

    n1_pad = os3_pad                    # rows of output1 == K of mlp3.fc1
    n2_pad = _round_up(n2, SUB_BF16)

    x1p = _pad2(input1, n1_pad, wdim, jnp.bfloat16)
    x2p = _pad2(input2, n2_pad, wdim, jnp.bfloat16)

    mm = 2 * wdim * wdim
    flops = int(3 * n1_pad * mm + 6 * n2_pad * mm          # mlp1 + (mlp2, mlp3.fc2/3, fc)
                + 2 * n2_pad * n1_pad * wdim               # combined
                + 2 * n2_pad * os3_pad * wdim)             # mlp3.fc1
    bytes_accessed = int(x1p.size * 2 + x2p.size * 2
                         + packed["wslab"].size * 2 + packed["w31"].size * 2
                         + packed["bslab"].size * 4 + n2_pad * wdim * 4)

    vmem = pl.BlockSpec(memory_space=pltpu.MemorySpace.VMEM)
    out = pl.pallas_call(
        functools.partial(_fused_kernel, num_classes=num_classes),
        out_shape=jax.ShapeDtypeStruct((n2_pad, wdim), jnp.float32),
        in_specs=[vmem] * 5,
        out_specs=vmem,
        compiler_params=pltpu.CompilerParams(vmem_limit_bytes=32 * 1024 * 1024),
        cost_estimate=pl.CostEstimate(flops=flops,
                                      transcendentals=int(n2_pad * wdim),
                                      bytes_accessed=bytes_accessed),
    )(x1p, x2p, packed["wslab"], packed["w31"], packed["bslab"])
    # TODO(synk): if N2 / feature dims ever outgrow VMEM, add a row-tiled grid
    # over N2 (dimension_semantics=("parallel",), weights given constant
    # index_maps so they stay resident); size the N2 block for v7x's 64 MiB VMEM.
    return out[:n2, :num_classes]


def make_forward(params):
    """Pack/pad parameters ONCE; return a (input1, input2) -> probs callable."""
    packed, cfg = pack_params(params)
    fwd = jax.jit(functools.partial(_forward_impl, **cfg))
    return lambda input1, input2: fwd(packed, input1, input2)


# --------------------------- Parameter handling -------------------------------

def init_linear_params(key, in_f, out_f):
    """PyTorch-style init: U(-1/sqrt(in), 1/sqrt(in)); weight stored (in, out)."""
    kw, kb = jax.random.split(key)
    bound = 1.0 / float(in_f) ** 0.5
    w = jax.random.uniform(kw, (in_f, out_f), jnp.float32, -bound, bound)
    b = jax.random.uniform(kb, (out_f,), jnp.float32, -bound, bound)
    return w, b


def init_mlp_params(key, input_size, hidden_size, output_size):
    k1, k2, k3 = jax.random.split(key, 3)
    return {
        "fc1": init_linear_params(k1, input_size, hidden_size),
        "fc2": init_linear_params(k2, hidden_size, hidden_size),
        "fc3": init_linear_params(k3, hidden_size, output_size),
    }


def init_shared_semantic_space(key, input_size1, input_size2, output_size3,
                               shared_hidden_size, output_size):
    k1, k2, k3, k4 = jax.random.split(key, 4)
    return {
        "mlp1": init_mlp_params(k1, input_size1, shared_hidden_size, output_size),
        "mlp2": init_mlp_params(k2, input_size2, shared_hidden_size, output_size),
        "mlp3": init_mlp_params(k3, output_size3, shared_hidden_size, output_size),
        "fc": init_linear_params(k4, output_size, 2),
    }


# ------------------------- Pure-JAX reference (check) -------------------------

def _mlp_ref(p, x):
    x = jnp.maximum(x @ p["fc1"][0] + p["fc1"][1], 0.0)
    x = jnp.maximum(x @ p["fc2"][0] + p["fc2"][1], 0.0)
    return x @ p["fc3"][0] + p["fc3"][1]


def _ref_forward(params, x1, x2):
    o1 = _mlp_ref(params["mlp1"], x1)
    o2 = _mlp_ref(params["mlp2"], x2)
    c = o2 @ o1.T
    f = _mlp_ref(params["mlp3"], c)
    logits = f @ params["fc"][0] + params["fc"][1]
    return jax.nn.softmax(logits, axis=1)


# ---------------------------------- Main --------------------------------------

if __name__ == "__main__":
    # Small shapes consistent with the module: combined_output is (N2, N1) and
    # feeds mlp3 whose input size is output_size3, so output_size3 == N1.
    input_size1 = 16
    input_size2 = 24
    N1 = 8
    N2 = 6
    output_size3 = N1          # = 8
    shared_hidden_size = 32
    output_size = 16

    key = jax.random.PRNGKey(0)
    kp, k1, k2 = jax.random.split(key, 3)

    params = init_shared_semantic_space(
        kp, input_size1, input_size2, output_size3, shared_hidden_size, output_size)

    input1 = jax.random.normal(k1, (N1, input_size1), jnp.float32)
    input2 = jax.random.normal(k2, (N2, input_size2), jnp.float32)

    fwd = make_forward(params)            # parameter padding/packing happens ONCE here
    out = jax.block_until_ready(fwd(input1, input2))

    assert out.shape == (N2, 2)
    # exact softmax -> rows sum to 1 tightly
    assert bool(jnp.all(jnp.abs(jnp.sum(out, axis=1) - 1.0) < 1e-4))
    # match the pure-JAX f32 reference (bf16 matmuls -> relaxed tolerance)
    ref = _ref_forward(params, input1, input2)
    assert bool(jnp.all(jnp.abs(out - ref) < 2e-2))
    print("KERNEL_OK")
</pallas_src>

<mosaic_0001>
module attributes {stable_mosaic.version = 11 : i64} {
  func.func @_fused_kernel(%arg0: memref<16x128xbf16, #tpu.memory_space<vmem>>, %arg1: memref<16x128xbf16, #tpu.memory_space<vmem>>, %arg2: memref<9x128x128xbf16, #tpu.memory_space<vmem>>, %arg3: memref<16x128xbf16, #tpu.memory_space<vmem>>, %arg4: memref<16x128xf32, #tpu.memory_space<vmem>>, %arg5: memref<16x128xf32, #tpu.memory_space<vmem>>) attributes {dimension_semantics = [], scalar_prefetch = 0 : i64, scratch_operands = 0 : i64, tpu.core_type = #tpu.core_type<tc>} {
    %c0 = arith.constant 0 : index
    %c0_0 = arith.constant 0 : index
    %0 = vector.load %arg0[%c0, %c0_0] : memref<16x128xbf16, #tpu.memory_space<vmem>>, vector<16x128xbf16>
    %c0_1 = arith.constant 0 : index
    %c0_2 = arith.constant 0 : index
    %c0_3 = arith.constant 0 : index
    %1 = vector.load %arg2[%c0_1, %c0_2, %c0_3] : memref<9x128x128xbf16, #tpu.memory_space<vmem>>, vector<1x128x128xbf16>
    %2 = vector.shape_cast %1 : vector<1x128x128xbf16> to vector<128x128xbf16>
    %cst = arith.constant dense<0.000000e+00> : vector<16x128xf32>
    %3 = tpu.matmul %0, %2, %cst {dimension_numbers = #tpu.dot_dimension_numbers<[1], [0], [0], [1], [0, 0, 1, 1], [], []>} : vector<16x128xbf16>, vector<128x128xbf16>, vector<16x128xf32> -> vector<16x128xf32>
    %c0_4 = arith.constant 0 : index
    %c0_5 = arith.constant 0 : index
    %4 = vector.load %arg4[%c0_4, %c0_5] : memref<16x128xf32, #tpu.memory_space<vmem>>, vector<1x128xf32>
    %5 = vector.broadcast %4 : vector<1x128xf32> to vector<16x128xf32>
    %6 = arith.addf %3, %5 : vector<16x128xf32>
    %cst_6 = arith.constant 0.000000e+00 : f32
    %7 = vector.broadcast %cst_6 : f32 to vector<16x128xf32>
    %8 = arith.maximumf %6, %7 : vector<16x128xf32>
    %9 = arith.truncf %8 : vector<16x128xf32> to vector<16x128xbf16>
    %c1 = arith.constant 1 : index
    %c0_7 = arith.constant 0 : index
    %c0_8 = arith.constant 0 : index
    %10 = vector.load %arg2[%c1, %c0_7, %c0_8] : memref<9x128x128xbf16, #tpu.memory_space<vmem>>, vector<1x128x128xbf16>
    %11 = vector.shape_cast %10 : vector<1x128x128xbf16> to vector<128x128xbf16>
    %cst_9 = arith.constant dense<0.000000e+00> : vector<16x128xf32>
    %12 = tpu.matmul %9, %11, %cst_9 {dimension_numbers = #tpu.dot_dimension_numbers<[1], [0], [0], [1], [0, 0, 1, 1], [], []>} : vector<16x128xbf16>, vector<128x128xbf16>, vector<16x128xf32> -> vector<16x128xf32>
    %c1_10 = arith.constant 1 : index
    %c0_11 = arith.constant 0 : index
    %13 = vector.load %arg4[%c1_10, %c0_11] : memref<16x128xf32, #tpu.memory_space<vmem>>, vector<1x128xf32>
    %14 = vector.broadcast %13 : vector<1x128xf32> to vector<16x128xf32>
    %15 = arith.addf %12, %14 : vector<16x128xf32>
    %cst_12 = arith.constant 0.000000e+00 : f32
    %16 = vector.broadcast %cst_12 : f32 to vector<16x128xf32>
    %17 = arith.maximumf %15, %16 : vector<16x128xf32>
    %18 = arith.truncf %17 : vector<16x128xf32> to vector<16x128xbf16>
    %c2 = arith.constant 2 : index
    %c0_13 = arith.constant 0 : index
    %c0_14 = arith.constant 0 : index
    %19 = vector.load %arg2[%c2, %c0_13, %c0_14] : memref<9x128x128xbf16, #tpu.memory_space<vmem>>, vector<1x128x128xbf16>
    %20 = vector.shape_cast %19 : vector<1x128x128xbf16> to vector<128x128xbf16>
    %cst_15 = arith.constant dense<0.000000e+00> : vector<16x128xf32>
    %21 = tpu.matmul %18, %20, %cst_15 {dimension_numbers = #tpu.dot_dimension_numbers<[1], [0], [0], [1], [0, 0, 1, 1], [], []>} : vector<16x128xbf16>, vector<128x128xbf16>, vector<16x128xf32> -> vector<16x128xf32>
    %c2_16 = arith.constant 2 : index
    %c0_17 = arith.constant 0 : index
    %22 = vector.load %arg4[%c2_16, %c0_17] : memref<16x128xf32, #tpu.memory_space<vmem>>, vector<1x128xf32>
    %23 = vector.broadcast %22 : vector<1x128xf32> to vector<16x128xf32>
    %24 = arith.addf %21, %23 : vector<16x128xf32>
    %25 = arith.truncf %24 : vector<16x128xf32> to vector<16x128xbf16>
    %c0_18 = arith.constant 0 : index
    %c0_19 = arith.constant 0 : index
    %26 = vector.load %arg1[%c0_18, %c0_19] : memref<16x128xbf16, #tpu.memory_space<vmem>>, vector<16x128xbf16>
    %c3 = arith.constant 3 : index
    %c0_20 = arith.constant 0 : index
    %c0_21 = arith.constant 0 : index
    %27 = vector.load %arg2[%c3, %c0_20, %c0_21] : memref<9x128x128xbf16, #tpu.memory_space<vmem>>, vector<1x128x128xbf16>
    %28 = vector.shape_cast %27 : vector<1x128x128xbf16> to vector<128x128xbf16>
    %cst_22 = arith.constant dense<0.000000e+00> : vector<16x128xf32>
    %29 = tpu.matmul %26, %28, %cst_22 {dimension_numbers = #tpu.dot_dimension_numbers<[1], [0], [0], [1], [0, 0, 1, 1], [], []>} : vector<16x128xbf16>, vector<128x128xbf16>, vector<16x128xf32> -> vector<16x128xf32>
    %c3_23 = arith.constant 3 : index
    %c0_24 = arith.constant 0 : index
    %30 = vector.load %arg4[%c3_23, %c0_24] : memref<16x128xf32, #tpu.memory_space<vmem>>, vector<1x128xf32>
    %31 = vector.broadcast %30 : vector<1x128xf32> to vector<16x128xf32>
    %32 = arith.addf %29, %31 : vector<16x128xf32>
    %cst_25 = arith.constant 0.000000e+00 : f32
    %33 = vector.broadcast %cst_25 : f32 to vector<16x128xf32>
    %34 = arith.maximumf %32, %33 : vector<16x128xf32>
    %35 = arith.truncf %34 : vector<16x128xf32> to vector<16x128xbf16>
    %c4 = arith.constant 4 : index
    %c0_26 = arith.constant 0 : index
    %c0_27 = arith.constant 0 : index
    %36 = vector.load %arg2[%c4, %c0_26, %c0_27] : memref<9x128x128xbf16, #tpu.memory_space<vmem>>, vector<1x128x128xbf16>
    %37 = vector.shape_cast %36 : vector<1x128x128xbf16> to vector<128x128xbf16>
    %cst_28 = arith.constant dense<0.000000e+00> : vector<16x128xf32>
    %38 = tpu.matmul %35, %37, %cst_28 {dimension_numbers = #tpu.dot_dimension_numbers<[1], [0], [0], [1], [0, 0, 1, 1], [], []>} : vector<16x128xbf16>, vector<128x128xbf16>, vector<16x128xf32> -> vector<16x128xf32>
    %c4_29 = arith.constant 4 : index
    %c0_30 = arith.constant 0 : index
    %39 = vector.load %arg4[%c4_29, %c0_30] : memref<16x128xf32, #tpu.memory_space<vmem>>, vector<1x128xf32>
    %40 = vector.broadcast %39 : vector<1x128xf32> to vector<16x128xf32>
    %41 = arith.addf %38, %40 : vector<16x128xf32>
    %cst_31 = arith.constant 0.000000e+00 : f32
    %42 = vector.broadcast %cst_31 : f32 to vector<16x128xf32>
    %43 = arith.maximumf %41, %42 : vector<16x128xf32>
    %44 = arith.truncf %43 : vector<16x128xf32> to vector<16x128xbf16>
    %c5 = arith.constant 5 : index
    %c0_32 = arith.constant 0 : index
    %c0_33 = arith.constant 0 : index
    %45 = vector.load %arg2[%c5, %c0_32, %c0_33] : memref<9x128x128xbf16, #tpu.memory_space<vmem>>, vector<1x128x128xbf16>
    %46 = vector.shape_cast %45 : vector<1x128x128xbf16> to vector<128x128xbf16>
    %cst_34 = arith.constant dense<0.000000e+00> : vector<16x128xf32>
    %47 = tpu.matmul %44, %46, %cst_34 {dimension_numbers = #tpu.dot_dimension_numbers<[1], [0], [0], [1], [0, 0, 1, 1], [], []>} : vector<16x128xbf16>, vector<128x128xbf16>, vector<16x128xf32> -> vector<16x128xf32>
    %c5_35 = arith.constant 5 : index
    %c0_36 = arith.constant 0 : index
    %48 = vector.load %arg4[%c5_35, %c0_36] : memref<16x128xf32, #tpu.memory_space<vmem>>, vector<1x128xf32>
    %49 = vector.broadcast %48 : vector<1x128xf32> to vector<16x128xf32>
    %50 = arith.addf %47, %49 : vector<16x128xf32>
    %51 = arith.truncf %50 : vector<16x128xf32> to vector<16x128xbf16>
    %cst_37 = arith.constant dense<0.000000e+00> : vector<16x16xf32>
    %52 = tpu.matmul %51, %25, %cst_37 {dimension_numbers = #tpu.dot_dimension_numbers<[1], [1], [0], [0], [0, 0, 1, 0], [], []>} : vector<16x128xbf16>, vector<16x128xbf16>, vector<16x16xf32> -> vector<16x16xf32>
    %53 = arith.truncf %52 : vector<16x16xf32> to vector<16x16xbf16>
    %c0_38 = arith.constant 0 : index
    %c0_39 = arith.constant 0 : index
    %54 = vector.load %arg3[%c0_38, %c0_39] : memref<16x128xbf16, #tpu.memory_space<vmem>>, vector<16x128xbf16>
    %cst_40 = arith.constant dense<0.000000e+00> : vector<16x128xf32>
    %55 = tpu.matmul %53, %54, %cst_40 {dimension_numbers = #tpu.dot_dimension_numbers<[1], [0], [0], [1], [0, 0, 1, 1], [], []>} : vector<16x16xbf16>, vector<16x128xbf16>, vector<16x128xf32> -> vector<16x128xf32>
    %c6 = arith.constant 6 : index
    %c0_41 = arith.constant 0 : index
    %56 = vector.load %arg4[%c6, %c0_41] : memref<16x128xf32, #tpu.memory_space<vmem>>, vector<1x128xf32>
    %57 = vector.broadcast %56 : vector<1x128xf32> to vector<16x128xf32>
    %58 = arith.addf %55, %57 : vector<16x128xf32>
    %cst_42 = arith.constant 0.000000e+00 : f32
    %59 = vector.broadcast %cst_42 : f32 to vector<16x128xf32>
    %60 = arith.maximumf %58, %59 : vector<16x128xf32>
    %61 = arith.truncf %60 : vector<16x128xf32> to vector<16x128xbf16>
    %c6_43 = arith.constant 6 : index
    %c0_44 = arith.constant 0 : index
    %c0_45 = arith.constant 0 : index
    %62 = vector.load %arg2[%c6_43, %c0_44, %c0_45] : memref<9x128x128xbf16, #tpu.memory_space<vmem>>, vector<1x128x128xbf16>
    %63 = vector.shape_cast %62 : vector<1x128x128xbf16> to vector<128x128xbf16>
    %cst_46 = arith.constant dense<0.000000e+00> : vector<16x128xf32>
    %64 = tpu.matmul %61, %63, %cst_46 {dimension_numbers = #tpu.dot_dimension_numbers<[1], [0], [0], [1], [0, 0, 1, 1], [], []>} : vector<16x128xbf16>, vector<128x128xbf16>, vector<16x128xf32> -> vector<16x128xf32>
    %c7 = arith.constant 7 : index
    %c0_47 = arith.constant 0 : index
    %65 = vector.load %arg4[%c7, %c0_47] : memref<16x128xf32, #tpu.memory_space<vmem>>, vector<1x128xf32>
    %66 = vector.broadcast %65 : vector<1x128xf32> to vector<16x128xf32>
    %67 = arith.addf %64, %66 : vector<16x128xf32>
    %cst_48 = arith.constant 0.000000e+00 : f32
    %68 = vector.broadcast %cst_48 : f32 to vector<16x128xf32>
    %69 = arith.maximumf %67, %68 : vector<16x128xf32>
    %70 = arith.truncf %69 : vector<16x128xf32> to vector<16x128xbf16>
    %c7_49 = arith.constant 7 : index
    %c0_50 = arith.constant 0 : index
    %c0_51 = arith.constant 0 : index
    %71 = vector.load %arg2[%c7_49, %c0_50, %c0_51] : memref<9x128x128xbf16, #tpu.memory_space<vmem>>, vector<1x128x128xbf16>
    %72 = vector.shape_cast %71 : vector<1x128x128xbf16> to vector<128x128xbf16>
    %cst_52 = arith.constant dense<0.000000e+00> : vector<16x128xf32>
    %73 = tpu.matmul %70, %72, %cst_52 {dimension_numbers = #tpu.dot_dimension_numbers<[1], [0], [0], [1], [0, 0, 1, 1], [], []>} : vector<16x128xbf16>, vector<128x128xbf16>, vector<16x128xf32> -> vector<16x128xf32>
    %c8 = arith.constant 8 : index
    %c0_53 = arith.constant 0 : index
    %74 = vector.load %arg4[%c8, %c0_53] : memref<16x128xf32, #tpu.memory_space<vmem>>, vector<1x128xf32>
    %75 = vector.broadcast %74 : vector<1x128xf32> to vector<16x128xf32>
    %76 = arith.addf %73, %75 : vector<16x128xf32>
    %77 = arith.truncf %76 : vector<16x128xf32> to vector<16x128xbf16>
    %c8_54 = arith.constant 8 : index
    %c0_55 = arith.constant 0 : index
    %c0_56 = arith.constant 0 : index
    %78 = vector.load %arg2[%c8_54, %c0_55, %c0_56] : memref<9x128x128xbf16, #tpu.memory_space<vmem>>, vector<1x128x128xbf16>
    %79 = vector.shape_cast %78 : vector<1x128x128xbf16> to vector<128x128xbf16>
    %cst_57 = arith.constant dense<0.000000e+00> : vector<16x128xf32>
    %80 = tpu.matmul %77, %79, %cst_57 {dimension_numbers = #tpu.dot_dimension_numbers<[1], [0], [0], [1], [0, 0, 1, 1], [], []>} : vector<16x128xbf16>, vector<128x128xbf16>, vector<16x128xf32> -> vector<16x128xf32>
    %c9 = arith.constant 9 : index
    %c0_58 = arith.constant 0 : index
    %81 = vector.load %arg4[%c9, %c0_58] : memref<16x128xf32, #tpu.memory_space<vmem>>, vector<1x128xf32>
    %82 = vector.broadcast %81 : vector<1x128xf32> to vector<16x128xf32>
    %83 = arith.addf %80, %82 : vector<16x128xf32>
    %84 = tpu.iota {dimensions = array<i32: 1>} : vector<16x128xi32>
    %c2_i32 = arith.constant 2 : i32
    %85 = vector.broadcast %c2_i32 : i32 to vector<16x128xi32>
    %86 = arith.cmpi slt, %84, %85 : vector<16x128xi32>
    %cst_59 = arith.constant -1.000000e+30 : f32
    %87 = vector.broadcast %cst_59 : f32 to vector<16x128xf32>
    %88 = arith.select %86, %83, %87 : vector<16x128xi1>, vector<16x128xf32>
    %cst_60 = arith.constant dense<0xFF800000> : vector<16xf32>
    %89 = vector.multi_reduction <maximumf>, %88, %cst_60 [1] : vector<16x128xf32> to vector<16xf32>
    %90 = vector.shape_cast %89 : vector<16xf32> to vector<16x1xf32>
    %91 = vector.broadcast %90 : vector<16x1xf32> to vector<16x128xf32>
    %92 = arith.subf %88, %91 : vector<16x128xf32>
    %93 = math.exp %92 : vector<16x128xf32>
    %cst_61 = arith.constant 0.000000e+00 : f32
    %94 = vector.broadcast %cst_61 : f32 to vector<16x128xf32>
    %95 = arith.select %86, %93, %94 : vector<16x128xi1>, vector<16x128xf32>
    %cst_62 = arith.constant dense<0.000000e+00> : vector<16xf32>
    %96 = vector.multi_reduction <add>, %95, %cst_62 [1] : vector<16x128xf32> to vector<16xf32>
    %97 = vector.shape_cast %96 : vector<16xf32> to vector<16x1xf32>
    %98 = vector.broadcast %97 : vector<16x1xf32> to vector<16x128xf32>
    %99 = arith.divf %95, %98 : vector<16x128xf32>
    %c0_63 = arith.constant 0 : index
    %c0_64 = arith.constant 0 : index
    %100 = vector.load %arg5[%c0_63, %c0_64] : memref<16x128xf32, #tpu.memory_space<vmem>>, vector<16x128xf32>
    tpu.vector_store %arg5[%c0_63, %c0_64], %99 {strides = array<i32>} : memref<16x128xf32, #tpu.memory_space<vmem>>, vector<16x128xf32>,
    return
  }
}

</mosaic_0001>

<bundles_post_ra>
// kernel: _forward_impl.1
= control target key start
LH: loop header
LB: loop body
LE: loop exit
PB: predicated region body
PF: predicated region fallthrough
CT: control target
= control target key end

     0   :  { %10 = vsyncpa [#allocation3], 0  ;;  %s1326_s21 = smov [#allocation2]   ;;  %s1327_s23 = smov 64   ;;  %s1411_s0 = inlined_call_operand.vmem [shape: bf16[16,128], index: 0, kind: input, shape index: {}]   ;;  %s1412_s1 = inlined_call_operand.vmem [shape: bf16[16,128], index: 1, kind: input, shape index: {}]   ;;  %s1413_s2 = inlined_call_operand.hbm [shape: bf16[9,128,128], index: 2, kind: input, shape index: {}]   ;;  %s1414_s3 = inlined_call_operand.vmem [shape: bf16[16,128], index: 3, kind: input, shape index: {}]   ;;  %s1415_s4 = inlined_call_operand.vmem [shape: f32[16,128], index: 4, kind: input, shape index: {}]   ;;  %s1416_s5 = inlined_call_operand.vmem [shape: f32[16,128], index: 5, kind: output, shape index: {}]  }
   0x1   :  { %s19_s20 = sshll.u32 %s1413_s2, 4  ;;  %s21_s22 = sshll.u32 %s1326_s21, 4  ;;  %s20_s20 = int_to_ptr.hbm [resolvable:$true] %s19_s20  ;;  %s22_s22 = int_to_ptr.vmem [resolvable:$true] %s21_s22 }
   0x2   :  { %s1328_s24 = smov 4  }
   0x3   :  { %27 = dma.hbm_to_vmem [thread:$0]  %s20_s20, 9216, %s22_s22, [#allocation3], %s1327_s23, %s1327_s23, %s1328_s24  }
   0x4   :  { %1324 = dma.done.wait [#allocation3], 9216  }
   0x5   :  { %1325 = vsyncadd [#allocation3], 4294958080  ;;  %v1212_v0 = vld [vmem:[#allocation2 + $0x38] sm:$0xff]  ;;  %v1211_v2 = vld [vmem:[#allocation2 + $0x30] sm:$0xff]  ;;  %vm577_vm0 = vcmask 130048  }
   0x6   :  { %v1237_v1 = vld [vmem:[#allocation2 + $0xf8] sm:$0xff]  ;;  %111 = vmatpush.bf16.msra.mxu0 %v1212_v0  ;;  %v1236_v3 = vld [vmem:[#allocation2 + $0xf0] sm:$0xff]  ;;  %v1210_v4 = vld [vmem:[#allocation2 + $0x28] sm:$0xff] }
   0x7   :  { %369 = vmatpush.bf16.msra.mxu3 %v1237_v1  ;;  %v1235_v5 = vld [vmem:[#allocation2 + $0xe8] sm:$0xff]  ;;  %v1220_v6 = vld [vmem:[#allocation2 + $0x78] sm:$0xff]  ;;  %v1209_v7 = vld [vmem:[#allocation2 + $0x20] sm:$0xff] }
   0x8   :  { %v1234_v8 = vld [vmem:[#allocation2 + $0xe0] sm:$0xff]  ;;  %195 = vmatpush.bf16.msra.mxu1 %v1220_v6  ;;  %v1219_v9 = vld [vmem:[#allocation2 + $0x70] sm:$0xff]  ;;  %v1218_v10 = vld [vmem:[#allocation2 + $0x68] sm:$0xff] }
   0x9   :  { %v1208_v11 = vld [vmem:[#allocation2 + $0x18] sm:$0xff]  ;;  %v1217_v13 = vld [vmem:[#allocation2 + $0x60] sm:$0xff]  ;;  %v1207_v14 = vld [vmem:[#allocation2 + $0x10] sm:$0xff] }
   0xa   :  { %112 = vmatpush.bf16.msra.mxu0 %v1211_v2  ;;  %v1233_v12 = vld [vmem:[#allocation2 + $0xd8] sm:$0xff]  ;;  %v1232_v15 = vld [vmem:[#allocation2 + $0xd0] sm:$0xff]  ;;  %v1206_v16 = vld [vmem:[#allocation2 + $0x8] sm:$0xff] }
   0xb   :  { %370 = vmatpush.bf16.msra.mxu3 %v1236_v3  ;;  %v1231_v17 = vld [vmem:[#allocation2 + $0xc8] sm:$0xff]  ;;  %v1205_v18 = vld [vmem:[#allocation2] sm:$0xff]  ;;  %v1245_v20 = vld [vmem:[#allocation2 + $0x138] sm:$0xff] }
   0xc   :  { %196 = vmatpush.bf16.msra.mxu1 %v1219_v9  ;;  %v1230_v19 = vld [vmem:[#allocation2 + $0xc0] sm:$0xff]  ;;  %v1244_v23 = vld [vmem:[#allocation2 + $0x130] sm:$0xff]  ;;  %v1243_v24 = vld [vmem:[#allocation2 + $0x128] sm:$0xff] }
   0xd   :  { %v1204_v21 = vld [vmem:[%s1411_s0] sm:$0xff]  ;;  %v1216_v25 = vld [vmem:[#allocation2 + $0x58] sm:$0xff]  ;;  %v1215_v27 = vld [vmem:[#allocation2 + $0x50] sm:$0xff] }
   0xe   :  { %113 = vmatpush.bf16.msra.mxu0 %v1210_v4  ;;  %v1229_v22 = vld [vmem:[%s1412_s1] sm:$0xff]  ;;  %v1241_v28 = vld [vmem:[#allocation2 + $0x118] sm:$0xff]  ;;  %v1214_v29 = vld [vmem:[#allocation2 + $0x48] sm:$0xff] }
   0xf   :  { %371 = vmatpush.bf16.msra.mxu3 %v1235_v5  ;;  %v1242_v26 = vld [vmem:[#allocation2 + $0x120] sm:$0xff]  ;;  %v1240_v30 = vld [vmem:[#allocation2 + $0x110] sm:$0xff]  ;;  %v1239_v32 = vld [vmem:[#allocation2 + $0x108] sm:$0xff] }
  0x10   :  { %197 = vmatpush.bf16.msra.mxu1 %v1218_v10  ;;  %v1213_v31 = vld [vmem:[#allocation2 + $0x40] sm:$0xff]  ;;  %v1228_v34 = vld [vmem:[#allocation2 + $0xb8] sm:$0xff]  ;;  %v1227_v36 = vld [vmem:[#allocation2 + $0xb0] sm:$0xff] }
  0x11   :  { %v1238_v33 = vld [vmem:[#allocation2 + $0x100] sm:$0xff]  ;;  %v1253_v35 = vld [vmem:[#allocation2 + $0x178] sm:$0xff]  ;;  %279 = vmatpush.bf16.msra.mxu2 %v1228_v34  ;;  %v1252_v37 = vld [vmem:[#allocation2 + $0x170] sm:$0xff] }
  0x12   :  { %114 = vmatpush.bf16.msra.mxu0 %v1209_v7  ;;  %v1226_v38 = vld [vmem:[#allocation2 + $0xa8] sm:$0xff]  ;;  %v1225_v40 = vld [vmem:[#allocation2 + $0xa0] sm:$0xff]  ;;  %v1224_v57 = vld [vmem:[#allocation2 + $0x98] sm:$0xff] }
  0x13   :  { %372 = vmatpush.bf16.msra.mxu3 %v1234_v8  ;;  %v1251_v39 = vld [vmem:[#allocation2 + $0x168] sm:$0xff]  ;;  %v1282_v42 = vld [vmem:[%s1415_s4] ss:$0 sm:$0xff]  ;;  %v1283_v45 = vld [vmem:[%s1415_s4 + $0x3] ss:$0 sm:$0xff] }
  0x14   :  { %198 = vmatpush.bf16.msra.mxu1 %v1217_v13  ;;  %v1250_v58 = vld [vmem:[#allocation2 + $0x160] sm:$0xff]  ;;  %v1223_v59 = vld [vmem:[#allocation2 + $0x90] sm:$0xff]  ;;  %v1249_v60 = vld [vmem:[#allocation2 + $0x158] sm:$0xff] }
  0x15   :  { %280 = vmatpush.bf16.msra.mxu2 %v1227_v36  ;;  %v1222_v61 = vld [vmem:[#allocation2 + $0x88] sm:$0xff]  ;;  %v1248_v62 = vld [vmem:[#allocation2 + $0x150] sm:$0xff]  ;;  %v1221_v63 = vld [vmem:[#allocation2 + $0x80] sm:$0xff] }
  0x16   :  { %115 = vmatpush.bf16.msra.mxu0 %v1208_v11  ;;  %v1247_v0 = vld [vmem:[#allocation2 + $0x148] sm:$0xff]  ;;  %v1246_v1 = vld [vmem:[#allocation2 + $0x140] sm:$0xff] }
  0x17   :  { %373 = vmatpush.bf16.msra.mxu3 %v1233_v12  ;;  %v1284_v3 = vld [vmem:[%s1415_s4 + $0x1] ss:$0 sm:$0xff]  ;;  %v1285_v7 = vld [vmem:[%s1415_s4 + $0x4] ss:$0 sm:$0xff] }
  0x18   :  { %199 = vmatpush.bf16.msra.mxu1 %v1216_v25  ;;  %v1259_v34 = vld [vmem:[#allocation2 + $0x1a0] sm:$0xff] }
  0x19   :  { %281 = vmatpush.bf16.msra.mxu2 %v1226_v38  ;;  %v1258_v38 = vld [vmem:[#allocation2 + $0x198] sm:$0xff] }
  0x1a   :  { %116 = vmatpush.bf16.msra.mxu0 %v1207_v14 }
  0x1b   :  { %374 = vmatpush.bf16.msra.mxu3 %v1232_v15 }
  0x1c   :  { %200 = vmatpush.bf16.msra.mxu1 %v1215_v27 }
  0x1d   :  { %282 = vmatpush.bf16.msra.mxu2 %v1225_v40  ;;  %v1256_v40 = vld [vmem:[#allocation2 + $0x188] sm:$0xff] }
  0x1e   :  { %117 = vmatpush.bf16.msra.mxu0 %v1206_v16 }
  0x1f   :  { %375 = vmatpush.bf16.msra.mxu3 %v1231_v17 }
  0x20   :  { %201 = vmatpush.bf16.msra.mxu1 %v1214_v29 }
  0x21   :  { %283 = vmatpush.bf16.msra.mxu2 %v1224_v57  ;;  %v1263_v57 = vld [vmem:[#allocation2 + $0x1c0] sm:$0xff] }
  0x22   :  { %118 = vmatpush.bf16.msra.mxu0 %v1205_v18 }
  0x23   :  { %376 = vmatpush.bf16.msra.mxu3 %v1230_v19 }
  0x24   :  { %202 = vmatpush.bf16.msra.mxu1 %v1213_v31  ;;  %v1262_v31 = vld [vmem:[#allocation2 + $0x1b8] sm:$0xff] }
  0x25   :  { %119 = vmatmul.bf16.vlgmr.msra.gmra.mxu0 %v1204_v21  ;;  %284 = vmatpush.bf16.msra.mxu2 %v1223_v59  ;;  %v1277_v59 = vld [vmem:[#allocation2 + $0x230] sm:$0xff] }
  0x26   :  { %453 = vmatpush.bf16.msrb.mxu0 %v1245_v20  ;;  %377 = vmatmul.bf16.vlgmr.msra.gmra.mxu3 %v1229_v22  ;;  %v1286_v20 = vld [vmem:[%s1415_s4 + $0x2] ss:$0 sm:$0xff] }
  0x28   :  { %537 = vmatpush.bf16.msrb.mxu1 %v1253_v35 }
  0x29   :  { %285 = vmatpush.bf16.msra.mxu2 %v1222_v61  ;;  %v1275_v61 = vld [vmem:[#allocation2 + $0x220] sm:$0xff] }
  0x2a   :  { %454 = vmatpush.bf16.msrb.mxu0 %v1244_v23 }
  0x2c   :  { %538 = vmatpush.bf16.msrb.mxu1 %v1252_v37 }
  0x2d   :  { %286 = vmatpush.bf16.msra.mxu2 %v1221_v63 }
  0x2e   :  { %455 = vmatpush.bf16.msrb.mxu0 %v1243_v24 }
  0x30   :  { %539 = vmatpush.bf16.msrb.mxu1 %v1251_v39  ;;  %v1257_v39 = vld [vmem:[#allocation2 + $0x190] sm:$0xff] }
  0x32   :  { %456 = vmatpush.bf16.msrb.mxu0 %v1242_v26  ;;  %v1287_v26 = vld [vmem:[%s1415_s4 + $0x5] ss:$0 sm:$0xff] }
  0x34   :  { %540 = vmatpush.bf16.msrb.mxu1 %v1250_v58  ;;  %v1278_v58 = vld [vmem:[#allocation2 + $0x238] sm:$0xff] }
  0x36   :  { %457 = vmatpush.bf16.msrb.mxu0 %v1241_v28 }
  0x38   :  { %541 = vmatpush.bf16.msrb.mxu1 %v1249_v60  ;;  %v1276_v60 = vld [vmem:[#allocation2 + $0x228] sm:$0xff] }
  0x3a   :  { %458 = vmatpush.bf16.msrb.mxu0 %v1240_v30  ;;  %v1254_v30 = vld [vmem:[%s1414_s3] sm:$0xff] }
  0x3b   :  { %588 = vmatpush.bf16.msrb.mxu3 %v1254_v30 }
  0x3c   :  { %542 = vmatpush.bf16.msrb.mxu1 %v1248_v62  ;;  %v1274_v62 = vld [vmem:[#allocation2 + $0x218] sm:$0xff] }
  0x3e   :  { %459 = vmatpush.bf16.msrb.mxu0 %v1239_v32  ;;  %v1261_v32 = vld [vmem:[#allocation2 + $0x1b0] sm:$0xff] }
  0x40   :  { %543 = vmatpush.bf16.msrb.mxu1 %v1247_v0  ;;  %v1289_v0 = vld [vmem:[%s1415_s4 + $0x7] ss:$0 sm:$0xff] }
  0x42   :  { %460 = vmatpush.bf16.msrb.mxu0 %v1238_v33  ;;  %v1260_v33 = vld [vmem:[#allocation2 + $0x1a8] sm:$0xff] }
  0x44   :  { %544 = vmatpush.bf16.msrb.mxu1 %v1246_v1 }
  0x46   :  { %831 = vmatpush.bf16.msra.mxu0 %v1278_v58 }
  0x4a   :  { %832 = vmatpush.bf16.msra.mxu0 %v1277_v59 }
  0x4e   :  { %833 = vmatpush.bf16.msra.mxu0 %v1276_v60 }
  0x52   :  { %834 = vmatpush.bf16.msra.mxu0 %v1275_v61 }
  0x56   :  { %835 = vmatpush.bf16.msra.mxu0 %v1274_v62 }
  0xa2   :  { %v120_v41 = vpop.f32.mrf.mxu0 }
  0xa3   :  { %v121_v44 = vadd.f32 %v1282_v42, %v120_v41  ;;  %v1255_v41 = vld [vmem:[#allocation2 + $0x180] sm:$0xff] }
  0xa5   :  { %v125_v48 = vmax.f32 %v121_v44, 0.0  ;;  %v1268_v44 = vld [vmem:[#allocation2 + $0x1e8] sm:$0xff] }
  0xa9   :  { %v378_v43 = vpop.f32.mrf.mxu3 }
  0xaa   :  { %v122_v46 = vpop.f32.mrf.mxu0  ;;  %v379_v49 = vadd.f32 %v1283_v45, %v378_v43  ;;  %v1269_v43 = vld [vmem:[#allocation2 + $0x1f0] sm:$0xff] }
  0xab   :  { %v123_v47 = vadd.f32 %v1282_v42, %v122_v46  ;;  %v1270_v42 = vld [vmem:[#allocation2 + $0x1f8] sm:$0xff] }
  0xac   :  { %v383_v53 = vmax.f32 %v379_v49, 0.0  ;;  %749 = vmatpush.bf16.msra.mxu3 %v1270_v42 }
  0xad   :  { %v126_v50 = vmax.f32 %v123_v47, 0.0  ;;  %v1288_v47 = vld [vmem:[%s1415_s4 + $0x6] ss:$0 sm:$0xff] }
  0xaf   :  { %v127_v51 = vpack.c.bf16 %v126_v50, %v125_v48 }
  0xb0   :  { %750 = vmatpush.bf16.msra.mxu3 %v1269_v43 }
  0xb1   :  { %v380_v52 = vpop.f32.mrf.mxu3  ;;  %203 = vmatmul.bf16.vlgmr.msra.gmra.mxu1 %v127_v51 }
  0xb2   :  { %v381_v54 = vadd.f32 %v1283_v45, %v380_v52  ;;  %v1267_v45 = vld [vmem:[#allocation2 + $0x1e0] sm:$0xff] }
  0xb4   :  { %v384_v55 = vmax.f32 %v381_v54, 0.0  ;;  %751 = vmatpush.bf16.msra.mxu3 %v1268_v44  ;;  %v1266_v54 = vld [vmem:[#allocation2 + $0x1d8] sm:$0xff] }
  0xb6   :  { %v385_v56 = vpack.c.bf16 %v384_v55, %v383_v53  ;;  %v1265_v55 = vld [vmem:[#allocation2 + $0x1d0] sm:$0xff] }
  0xb8   :  { %461 = vmatmul.bf16.vlgmr.msrb.gmra.mxu0 %v385_v56  ;;  %752 = vmatpush.bf16.msra.mxu3 %v1267_v45  ;;  %v1264_v56 = vld [vmem:[#allocation2 + $0x1c8] sm:$0xff] }
  0xbc   :  { %753 = vmatpush.bf16.msra.mxu3 %v1266_v54 }
  0xc0   :  { %754 = vmatpush.bf16.msra.mxu3 %v1265_v55 }
  0xc4   :  { %755 = vmatpush.bf16.msra.mxu3 %v1264_v56 }
  0xc8   :  { %756 = vmatpush.bf16.msra.mxu3 %v1263_v57 }
 0x12e   :  { %v204_v2 = vpop.f32.mrf.mxu1 }
 0x12f   :  { %v205_v5 = vadd.f32 %v1284_v3, %v204_v2 }
 0x131   :  { %v209_v9 = vmax.f32 %v205_v5, 0.0 }
 0x135   :  { %v462_v4 = vpop.f32.mrf.mxu0 }
 0x136   :  { %v206_v6 = vpop.f32.mrf.mxu1  ;;  %v463_v11 = vadd.f32 %v1285_v7, %v462_v4 }
 0x137   :  { %v207_v8 = vadd.f32 %v1284_v3, %v206_v6 }
 0x138   :  { %v467_v15 = vmax.f32 %v463_v11, 0.0  ;;  %v1290_v11 = vld [vmem:[%s1415_s4 + $0x8] ss:$0 sm:$0xff] }
 0x139   :  { %v210_v10 = vmax.f32 %v207_v8, 0.0  ;;  %v1272_v8 = vld [vmem:[#allocation2 + $0x208] sm:$0xff] }
 0x13b   :  { %v211_v12 = vpack.c.bf16 %v210_v10, %v209_v9  ;;  %v1271_v9 = vld [vmem:[#allocation2 + $0x200] sm:$0xff] }
 0x13d   :  { %v464_v13 = vpop.f32.mrf.mxu0  ;;  %287 = vmatmul.bf16.vlgmr.msra.gmra.mxu2 %v211_v12 }
 0x13e   :  { %v465_v14 = vadd.f32 %v1285_v7, %v464_v13  ;;  %v1273_v7 = vld [vmem:[#allocation2 + $0x210] sm:$0xff] }
 0x13f   :  { %836 = vmatpush.bf16.msra.mxu0 %v1273_v7 }
 0x140   :  { %v468_v16 = vmax.f32 %v465_v14, 0.0 }
 0x142   :  { %v469_v17 = vpack.c.bf16 %v468_v16, %v467_v15  ;;  %v845_v16 = vlaneseq }
 0x143   :  { %837 = vmatpush.bf16.msra.mxu0 %v1272_v8 }
 0x144   :  { %545 = vmatmul.bf16.vlgmr.msrb.gmra.mxu1 %v469_v17  ;;  %v846_v17 = vand.u32 127, %v845_v16 }
 0x146   :  { %vm847_vm1 = vcmp.lt.s32.totalorder %v846_v17, 2 }
 0x147   :  { %838 = vmatpush.bf16.msra.mxu0 %v1271_v9 }
 0x1c0   :  { %v288_v18 = vpop.f32.mrf.mxu2 }
 0x1c1   :  { %v546_v19 = vpop.f32.mrf.mxu1  ;;  %v289_v22 = vadd.f32 %v1286_v20, %v288_v18  ;;  %v1291_v18 = vld [vmem:[%s1415_s4 + $0x9] ss:$0 sm:$0xff] }
 0x1c2   :  { %v547_v28 = vadd.f32 %v1287_v26, %v546_v19 }
 0x1c8   :  { %v290_v21 = vpop.f32.mrf.mxu2 }
 0x1c9   :  { %v291_v23 = vadd.f32 %v1286_v20, %v290_v21  ;;  %v548_v24 = vpop.f32.mrf.mxu1 }
 0x1ca   :  { %v549_v27 = vadd.f32 %v1287_v26, %v548_v24 }
 0x1cb   :  { %v293_v25 = vpack.c.bf16 %v291_v23, %v289_v22 }
 0x1cc   :  { %v551_v29 = vpack.c.bf16 %v549_v27, %v547_v28 }
 0x1cd   :  { %559 = vmatpush.bf16.xpose.msrb.mxu2 %v293_v25 }
 0x1d4   :  { %560 = vmatmul.bf16.vlgmr.msrb.gmra.mxu2 %v551_v29 }
 0x1d5   :  { %665 = vmatpush.bf16.msra.mxu2 %v1262_v31 }
 0x1d9   :  { %666 = vmatpush.bf16.msra.mxu2 %v1261_v32 }
 0x1dd   :  { %667 = vmatpush.bf16.msra.mxu2 %v1260_v33 }
 0x1e1   :  { %668 = vmatpush.bf16.msra.mxu2 %v1259_v34 }
 0x1e5   :  { %669 = vmatpush.bf16.msra.mxu2 %v1258_v38 }
 0x1e9   :  { %670 = vmatpush.bf16.msra.mxu2 %v1257_v39 }
 0x1ed   :  { %671 = vmatpush.bf16.msra.mxu2 %v1256_v40 }
 0x1f1   :  { %672 = vmatpush.bf16.msra.mxu2 %v1255_v41 }
 0x257   :  { %v561_v35 = vpop.f32.mrf.mxu2 }
 0x25f   :  { %v563_v36 = vpop.f32.mrf.mxu2 }
 0x260   :  { %v566_v37 = vpack.c.bf16 %v563_v36, %v561_v35 }
 0x262   :  { %1107 = vmatmul.msk.bf16.vlgmr.msrb.gmra.mxu3 %vm577_vm0, %v566_v37 }
 0x2e5   :  { %v590_v46 = vpop.f32.mrf.mxu3 }
 0x2e6   :  { %v591_v48 = vadd.f32 %v1288_v47, %v590_v46 }
 0x2e8   :  { %v595_v51 = vmax.f32 %v591_v48, 0.0 }
 0x2ed   :  { %v592_v49 = vpop.f32.mrf.mxu3 }
 0x2ee   :  { %v593_v50 = vadd.f32 %v1288_v47, %v592_v49 }
 0x2f0   :  { %v596_v52 = vmax.f32 %v593_v50, 0.0 }
 0x2f2   :  { %v597_v53 = vpack.c.bf16 %v596_v52, %v595_v51 }
 0x2f4   :  { %673 = vmatmul.bf16.vlgmr.msra.gmra.mxu2 %v597_v53 }
 0x377   :  { %v674_v63 = vpop.f32.mrf.mxu2 }
 0x378   :  { %v675_v1 = vadd.f32 %v1289_v0, %v674_v63 }
 0x37a   :  { %v679_v4 = vmax.f32 %v675_v1, 0.0 }
 0x37f   :  { %v676_v2 = vpop.f32.mrf.mxu2 }
 0x380   :  { %v677_v3 = vadd.f32 %v1289_v0, %v676_v2 }
 0x382   :  { %v680_v5 = vmax.f32 %v677_v3, 0.0 }
 0x384   :  { %v681_v6 = vpack.c.bf16 %v680_v5, %v679_v4 }
 0x386   :  { %757 = vmatmul.bf16.vlgmr.msra.gmra.mxu3 %v681_v6 }
 0x409   :  { %v758_v10 = vpop.f32.mrf.mxu3 }
 0x40a   :  { %v759_v13 = vadd.f32 %v1290_v11, %v758_v10 }
 0x411   :  { %v760_v12 = vpop.f32.mrf.mxu3 }
 0x412   :  { %v761_v14 = vadd.f32 %v1290_v11, %v760_v12 }
 0x414   :  { %v763_v15 = vpack.c.bf16 %v761_v14, %v759_v13 }
 0x416   :  { %839 = vmatmul.bf16.vlgmr.msra.gmra.mxu0 %v763_v15 }
 0x493   :  { %v840_v19 = vpop.f32.mrf.mxu0 }
 0x494   :  { %v841_v20 = vadd.f32 %v1291_v18, %v840_v19 }
 0x496   :  { %v848_v21 = vsel %vm847_vm1, %v841_v20, -1e+30 }
 0x497   :  { %850 = vmax.xlane.f32.xlu0 %v848_v21 }
 0x49b   :  { %v842_v22 = vpop.f32.mrf.mxu0 }
 0x49c   :  { %v843_v23 = vadd.f32 %v1291_v18, %v842_v22 }
 0x49e   :  { %v849_v24 = vsel %vm847_vm1, %v843_v23, -1e+30 }
 0x49f   :  { %852 = vmax.xlane.f32.xlu0 %v849_v24 }
 0x50a   :  { %v851_v25 = vpop.xlane.xlu0 %850 }
 0x50b   :  { %v854_v26 = vsub.f32 %v848_v21, %v851_v25 }
 0x50d   :  { %v856_v27 = vmul.f32 1.442695, %v854_v26 }
 0x50f   :  { %1292 = vpow2.f32 %v856_v27 }
 0x512   :  { %v853_v28 = vpop.xlane.xlu0 %852 }
 0x513   :  { %v855_v29 = vsub.f32 %v849_v24, %v853_v28 }
 0x515   :  { %v1293_v30 = vpop.eup %1292  ;;  %v858_v31 = vmul.f32 1.442695, %v855_v29 }
 0x516   :  { %v860_v32 = vsel %vm847_vm1, %v1293_v30, 0.0 }
 0x517   :  { %1294 = vpow2.f32 %v858_v31  ;;  %862 = vadd.xlane.f32.xlu1 %v860_v32 }
 0x51d   :  { %v1295_v33 = vpop.eup %1294 }
 0x51e   :  { %v861_v34 = vsel %vm847_vm1, %v1295_v33, 0.0 }
 0x51f   :  { %864 = vadd.xlane.f32.xlu1 %v861_v34 }
 0x58a   :  { %v863_v35 = vpop.xlane.xlu1 %862 }
 0x58b   :  { %1296 = vrcp.f32 %v863_v35  ;;  %v877_v40 = vand.u32 2147483648, %v863_v35  ;;  %v875_v42 = vand.u32 2147483647, %v863_v35  ;;  %vm871_vm3 = vweird.f32 %v863_v35 }
 0x58d   :  { %v878_v45 = vor.u32 1.1754944e-38, %v877_v40  ;;  %vm876_vm5 = vcmp.eq.f32.partialorder %v875_v42, 8.507059e+37 }
 0x591   :  { %v1297_v36 = vpop.eup %1296 }
 0x592   :  { %v867_v37 = vmul.f32 %v1297_v36, %v863_v35  ;;  %v865_v38 = vpop.xlane.xlu1 %864  ;;  %vm872_vm2 = vweird.f32 %v1297_v36 }
 0x593   :  { %1298 = vrcp.f32 %v865_v38  ;;  %vm873_vm4 = vmor %vm871_vm3, %vm872_vm2  ;;  %v892_v51 = vand.u32 2147483648, %v865_v38  ;;  %v890_v53 = vand.u32 2147483647, %v865_v38  ;;  %vm886_vm7 = vweird.f32 %v865_v38 }
 0x594   :  { %v868_v39 = vsub.f32 1.0, %v867_v37 }
 0x595   :  { %v893_v55 = vor.u32 1.1754944e-38, %v892_v51  ;;  %vm891_vm9 = vcmp.eq.f32.partialorder %v890_v53, 8.507059e+37 }
 0x596   :  { %v869_v41 = vmul.f32 %v1297_v36, %v868_v39 }
 0x598   :  { %v870_v43 = vadd.f32 %v1297_v36, %v869_v41 }
 0x599   :  { %v1299_v44 = vpop.eup %1298 }
 0x59a   :  { %v874_v46 = vsel %vm873_vm4, %v1297_v36, %v870_v43  ;;  %v882_v47 = vmul.f32 %v1299_v44, %v865_v38  ;;  %vm887_vm6 = vweird.f32 %v1299_v44 }
 0x59b   :  { %v879_v48 = vsel %vm876_vm5, %v878_v45, %v874_v46  ;;  %vm888_vm8 = vmor %vm886_vm7, %vm887_vm6 }
 0x59c   :  { %v880_v49 = vmul.f32 %v879_v48, %v860_v32  ;;  %v883_v50 = vsub.f32 1.0, %v882_v47 }
 0x59e   :  { %896 = vst [vmem:[%s1416_s5] sm:$0xff] %v880_v49  ;;  %v884_v52 = vmul.f32 %v1299_v44, %v883_v50 }
 0x5a0   :  { %v885_v54 = vadd.f32 %v1299_v44, %v884_v52 }
 0x5a2   :  { %v889_v56 = vsel %vm888_vm8, %v1299_v44, %v885_v54 }
 0x5a3   :  { %v894_v57 = vsel %vm891_vm9, %v893_v55, %v889_v56 }
 0x5a4   :  { %v895_v58 = vmul.f32 %v894_v57, %v861_v34 }
 0x5a6   :  { %897 = vst [vmem:[%s1416_s5 + $0x8] sm:$0xff] %v895_v58 }
 0x5a7   :  { %902 = vsyncpa [#allocation3], 1 }

</bundles_post_ra>
